<compile_context>
chip_gen: v6e
topology: v6e:2x2x1
jax: 0.10.0
libtpu: 0.0.40
codegen_flags: <defaults>
</compile_context>

<pallas_src>
import jax
import jax.numpy as jnp
from jax.experimental import pallas as pl
from jax.experimental.pallas import tpu as pltpu


def _build_pe_table(hidden_size: int, max_len: int = 300) -> jnp.ndarray:
    """Deterministic pe table, shape (max_len, 1, hidden_size), float32.

    Matches the PyTorch module:
        pos   = arange(max_len)[:, None]
        denom = 10000 ** (arange(0, hidden, 2) / hidden)
        pe[:, 0, 0::2] = sin(pos / denom)
        pe[:, 0, 1::2] = cos(pos / denom)
    """
    assert hidden_size % 2 == 0, "hidden_size must be even (as in the PyTorch module)"
    pos = jnp.arange(max_len, dtype=jnp.float32)[:, None]                   # (L, 1)
    denom = jnp.power(
        10000.0, jnp.arange(0, hidden_size, 2, dtype=jnp.float32) / hidden_size
    )                                                                        # (H/2,)
    angles = pos / denom                                                     # (L, H/2)
    pe = jnp.stack([jnp.sin(angles), jnp.cos(angles)], axis=-1)              # (L, H/2, 2)
    pe = pe.reshape(max_len, hidden_size)                                    # interleave
    return pe[:, None, :]                                                    # (L, 1, H)


def _add_pe_kernel(x_ref, pe_ref, o_ref):
    # x_ref : (tS, tB, H) VMEM, input dtype
    # pe_ref: (tS, 1,  H) VMEM, float32 (read once per sequence tile)
    # o_ref : (tS, tB, H) VMEM, input dtype
    # Add in f32 (VPU slack is huge), broadcast over batch in-register, cast once.
    o_ref[...] = (x_ref[...].astype(jnp.float32) + pe_ref[...]).astype(o_ref.dtype)


def _roundup(x: int, m: int) -> int:
    return -(-x // m) * m


def _vmem_limit_bytes() -> int:
    """Generation-aware scoped-VMEM limit with headroom for Mosaic scratch."""
    cap = None
    try:
        cap = getattr(pltpu.get_tpu_info(), "vmem_capacity_bytes", None)
    except Exception:
        cap = None
    if cap is None:
        cap = 64 << 20  # conservative fallback: v7x per-TensorCore VMEM
    # leave ~16 MiB headroom, cap at 96 MiB, never go below 32 MiB
    return int(max(32 << 20, min(cap - (16 << 20), 96 << 20)))


def positional_encoding_forward(
    embedded: jnp.ndarray,
    pe_table: jnp.ndarray,
    *,
    tile_bytes: int = 8 * 1024 * 1024,   # target x-tile (padded) size ~8 MiB
) -> jnp.ndarray:
    """embedded: (S, B, H); pe_table: (max_len, 1, H) float32. Returns (S, B, H)."""
    S, B, H = embedded.shape
    if S > pe_table.shape[0]:
        raise ValueError(f"sequence length {S} exceeds pe table length {pe_table.shape[0]}")
    assert pe_table.shape[2] == H

    itemsize = jnp.dtype(embedded.dtype).itemsize
    sub = 8 if itemsize >= 4 else 16          # sublane packing (f32: 8, bf16: 16)
    H_pad = _roundup(H, 128)                  # lane padding
    vmem_limit = _vmem_limit_bytes()
    headroom = (vmem_limit * 3) // 4          # budget for double-buffered tiles

    def footprint(tS: int, tB: int) -> int:
        # Double-buffered (x + out) tiles + pe tile, using padded (sublane, lane) dims.
        b_pad = _roundup(tB, sub)
        x_t = tS * b_pad * H_pad * itemsize
        pe_t = tS * 8 * H_pad * 4             # pe is f32, middle dim 1 pads to 8
        return 2 * (2 * x_t + pe_t)

    # --- batch tiling: only split B if a single (B, H) slab can't fit the budget ---
    tB = B
    if footprint(1, B) > headroom:
        tB = sub
        while tB + sub < B and footprint(1, tB + sub) <= headroom:
            tB += sub
        tB = min(tB, B)
        # TODO(synk): if even (1, sub, H) overflows VMEM, H would need tiling too.

    # --- sequence tiling: byte-budget target, shrink to fit, then balance ---
    row_bytes = _roundup(tB, sub) * H_pad * itemsize
    tS = max(1, min(S, tile_bytes // row_bytes))
    while tS > 1 and footprint(tS, tB) > headroom:
        tS = max(1, tS // 2)
    n_steps = pl.cdiv(S, tS)
    # For large problems, guarantee enough grid steps that v7x's two TensorCores
    # both get work (grid axes are "parallel"); skip for tiny shapes where fixed
    # per-step overhead (~0.35 us) would dominate.
    if S * row_bytes >= (4 << 20):
        n_steps = max(n_steps, min(8, S))
    tS = pl.cdiv(S, n_steps)                  # balanced tiles, no tiny ragged tail

    grid = (pl.cdiv(S, tS), pl.cdiv(B, tB))

    return pl.pallas_call(
        _add_pe_kernel,
        out_shape=jax.ShapeDtypeStruct((S, B, H), embedded.dtype),
        grid_spec=pltpu.PrefetchScalarGridSpec(
            num_scalar_prefetch=0,
            grid=grid,
            in_specs=[
                # x: (sequence tile, batch tile, full H)
                pl.BlockSpec((tS, tB, H), lambda i, j: (i, j, 0)),
                # pe: same sequence tile, read straight from the full (300,1,H)
                # f32 table; index_map ignores the batch axis so it is never
                # re-fetched per batch tile.
                pl.BlockSpec((tS, 1, H), lambda i, j: (i, 0, 0)),
            ],
            out_specs=pl.BlockSpec((tS, tB, H), lambda i, j: (i, j, 0)),
        ),
        compiler_params=pltpu.CompilerParams(
            # Independent tiles -> both axes "parallel" (megacore sharding on v7x).
            dimension_semantics=("parallel", "parallel"),
            vmem_limit_bytes=vmem_limit,
        ),
    )(embedded, pe_table)


if __name__ == "__main__":
    seq_len, batch, hidden = 8, 2, 32

    key = jax.random.PRNGKey(0)
    embedded = jax.random.normal(key, (seq_len, batch, hidden), dtype=jnp.float32)

    pe_table = _build_pe_table(hidden)  # (300, 1, hidden), float32, deterministic

    out = positional_encoding_forward(embedded, pe_table)
    out = jax.block_until_ready(out)

    # correctness check vs pure-JAX reference
    ref = embedded + pe_table[:seq_len]
    assert out.shape == (seq_len, batch, hidden)
    assert out.dtype == embedded.dtype
    assert jnp.allclose(out, ref, atol=1e-6), "mismatch vs reference"

    print("KERNEL_OK")
</pallas_src>

<mosaic_0001>
module attributes {stable_mosaic.version = 11 : i64} {
  func.func @_add_pe_kernel(%arg0: i32, %arg1: i32, %arg2: memref<8x2x32xf32, #tpu.memory_space<vmem>>, %arg3: memref<8x1x32xf32, #tpu.memory_space<vmem>>, %arg4: memref<8x2x32xf32, #tpu.memory_space<vmem>>) attributes {dimension_semantics = [#tpu.dimension_semantics<parallel>, #tpu.dimension_semantics<parallel>], iteration_bounds = array<i64: 1, 1>, scalar_prefetch = 0 : i64, scratch_operands = 0 : i64, tpu.core_type = #tpu.core_type<tc>, window_params = [{transform_indices = @transform_0, window_bounds = array<i64: 8, 2, 32>}, {transform_indices = @transform_1, window_bounds = array<i64: 8, 1, 32>}, {transform_indices = @transform_2, window_bounds = array<i64: 8, 2, 32>}]} {
    %c0 = arith.constant 0 : index
    %c0_0 = arith.constant 0 : index
    %c0_1 = arith.constant 0 : index
    %0 = vector.load %arg2[%c0, %c0_0, %c0_1] : memref<8x2x32xf32, #tpu.memory_space<vmem>>, vector<8x2x32xf32>
    %c0_2 = arith.constant 0 : index
    %c0_3 = arith.constant 0 : index
    %c0_4 = arith.constant 0 : index
    %1 = vector.load %arg3[%c0_2, %c0_3, %c0_4] : memref<8x1x32xf32, #tpu.memory_space<vmem>>, vector<8x1x32xf32>
    %2 = vector.broadcast %1 : vector<8x1x32xf32> to vector<8x2x32xf32>
    %3 = arith.addf %0, %2 : vector<8x2x32xf32>
    %c0_5 = arith.constant 0 : index
    %c0_6 = arith.constant 0 : index
    %c0_7 = arith.constant 0 : index
    %4 = vector.load %arg4[%c0_5, %c0_6, %c0_7] : memref<8x2x32xf32, #tpu.memory_space<vmem>>, vector<8x2x32xf32>
    tpu.vector_store %arg4[%c0_5, %c0_6, %c0_7], %3 {strides = array<i32>} : memref<8x2x32xf32, #tpu.memory_space<vmem>>, vector<8x2x32xf32>,
    return
  }
  func.func @transform_0(%arg0: i32, %arg1: i32) -> (i32, i32, i32) {
    %c0_i32 = arith.constant 0 : i32
    %c0_i32_0 = arith.constant 0 : i32
    return %arg0, %arg1, %c0_i32 : i32, i32, i32
  }
  func.func @transform_1(%arg0: i32, %arg1: i32) -> (i32, i32, i32) {
    %c0_i32 = arith.constant 0 : i32
    %c0_i32_0 = arith.constant 0 : i32
    %c0_i32_1 = arith.constant 0 : i32
    return %arg0, %c0_i32, %c0_i32_0 : i32, i32, i32
  }
  func.func @transform_2(%arg0: i32, %arg1: i32) -> (i32, i32, i32) {
    %c0_i32 = arith.constant 0 : i32
    %c0_i32_0 = arith.constant 0 : i32
    return %arg0, %arg1, %c0_i32 : i32, i32, i32
  }
}

</mosaic_0001>

<bundles_post_ra>
// kernel: tpu_custom_call.1
= control target key start
LH: loop header
LB: loop body
LE: loop exit
PB: predicated region body
PF: predicated region fallthrough
CT: control target
= control target key end

     0   :  { %vm84_vm0 = vcmask 254976   ;;  %s219_s0 = inlined_call_operand.vmem [shape: f32[8,2,32], index: 0, kind: input, shape index: {}]   ;;  %s220_s1 = inlined_call_operand.vmem [shape: f32[300,1,32], index: 1, kind: input, shape index: {}]   ;;  %s221_s2 = inlined_call_operand.hbm [shape: f32[8,2,32], index: 2, kind: output, shape index: {}]  }
   0x1   :  { %v12_v0 = vld [vmem:[%s219_s0] sm:$0x3]  ;;  %v13_v3 = vld [vmem:[%s219_s0 + $0x2] sm:$0x3]  ;;  %v14_v5 = vld [vmem:[%s219_s0 + $0x4] sm:$0x3] }
   0x2   :  { %v109_v1 = vld [vmem:[%s220_s1] ss:$0 sm:$0xff]  ;;  %v110_v4 = vld [vmem:[%s220_s1 + $0x1] ss:$0 sm:$0xff]  ;;  %v111_v7 = vld [vmem:[%s220_s1 + $0x2] ss:$0 sm:$0xff] }
   0x3   :  { %v76_v2 = vadd.f32 %v109_v1, %v12_v0  ;;  %v77_v6 = vadd.f32 %v110_v4, %v13_v3  ;;  %v15_v8 = vld [vmem:[%s219_s0 + $0x6] sm:$0x3]  ;;  %v112_v9 = vld [vmem:[%s220_s1 + $0x3] ss:$0 sm:$0xff]  ;;  %v78_v10 = vadd.f32 %v111_v7, %v14_v5  ;;  %v16_v12 = vld [vmem:[%s219_s0 + $0x8] sm:$0x3] }
   0x4   :  { %v79_v11 = vadd.f32 %v112_v9, %v15_v8  ;;  %v113_v13 = vld [vmem:[%s220_s1 + $0x4] ss:$0 sm:$0xff]  ;;  %v17_v14 = vld [vmem:[%s219_s0 + $0xa] sm:$0x3]  ;;  %v114_v16 = vld [vmem:[%s220_s1 + $0x5] ss:$0 sm:$0xff] }
   0x5   :  { %85 = vst.msk [vmem:[#allocation2] sm:$0x3] %vm84_vm0, %v76_v2  ;;  %86 = vst.msk [vmem:[#allocation2 + $0x2] sm:$0x3] %vm84_vm0, %v77_v6  ;;  %v80_v15 = vadd.f32 %v113_v13, %v16_v12  ;;  %v18_v17 = vld [vmem:[%s219_s0 + $0xc] sm:$0x3]  ;;  %v81_v19 = vadd.f32 %v114_v16, %v17_v14 }
   0x6   :  { %v115_v18 = vld [vmem:[%s220_s1 + $0x6] ss:$0 sm:$0xff]  ;;  %87 = vst.msk [vmem:[#allocation2 + $0x4] sm:$0x3] %vm84_vm0, %v78_v10  ;;  %88 = vst.msk [vmem:[#allocation2 + $0x6] sm:$0x3] %vm84_vm0, %v79_v11 }
   0x7   :  { %v82_v20 = vadd.f32 %v115_v18, %v18_v17  ;;  %v19_v21 = vld [vmem:[%s219_s0 + $0xe] sm:$0x3]  ;;  %v116_v22 = vld [vmem:[%s220_s1 + $0x7] ss:$0 sm:$0xff] }
   0x8   :  { %7 = vsyncpa [#allocation3], 0  ;;  %89 = vst.msk [vmem:[#allocation2 + $0x8] sm:$0x3] %vm84_vm0, %v80_v15  ;;  %v83_v23 = vadd.f32 %v116_v22, %v19_v21  ;;  %s142_s13 = smov [#allocation2]  }
   0x9   :  { %s98_s14 = sshll.u32 %s142_s13, 4  ;;  %90 = vst.msk [vmem:[#allocation2 + $0xa] sm:$0x3] %vm84_vm0, %v81_v19  ;;  %91 = vst.msk [vmem:[#allocation2 + $0xc] sm:$0x3] %vm84_vm0, %v82_v20  ;;  %s99_s14 = int_to_ptr.vmem [resolvable:$true] %s98_s14 }
   0xa   :  { %92 = vst.msk [vmem:[#allocation2 + $0xe] sm:$0x3] %vm84_vm0, %v83_v23  ;;  %s120_s15 = scalar_lea.vmem %s99_s14, 256  ;;  %p125_p1 = scmp.lt.s32.totalorder %s99_s14, %s99_s14 }
   0xb   :  { %p121_p0 = scmp.ne.s32.totalorder %s99_s14, %s120_s15  ;;  %p126_p2 = scmp.lt.s32.totalorder %s120_s15, %s120_s15 }
   0xd   :  { %p127_p3 = por %p126_p2, %p125_p1 }
   0xf   :  { %p128_p4 = pnand %p127_p3, %p121_p0 }
  0x11   :  { %131 = shalt.err (!%p128_p4)
}
  0x12   :  { %s143_s0 = smov 32   ;;  %s144_s1 = smov 2  }
  0x13   :  { %104 = dma.vmem_to_hbm [thread:$0]  %s99_s14, 256, %s221_s2, [#allocation3], %s143_s0, %s143_s0, %s144_s1  }
  0x14   :  { %140 = dma.done.wait [#allocation3], 256  }
  0x15   :  { %141 = vsyncadd [#allocation3], 4294967040 }
  0x16   :  { %108 = vsyncpa [#allocation3], 1 }

</bundles_post_ra>
